<compile_context>
chip_gen: v7x
topology: tpu7x:2x2x1
jax: 0.10.0
libtpu: 0.0.40
codegen_flags: <defaults>
</compile_context>

<pallas_src>
import functools

import jax
import jax.numpy as jnp
from jax.experimental import pallas as pl
from jax.experimental.pallas import tpu as pltpu


def _zoneout_lstm_seq_kernel(x_ref, wh_ref, wx_ref, b_ref,
                             h0_ref, c0_ref, o0_ref,
                             h_out_ref, c_out_ref, o_out_ref,
                             h_scr, c_scr, o_scr,
                             *, hidden_size, p):
    """One timestep per grid iteration; h/c/o state carried in VMEM scratch."""
    t = pl.program_id(0)

    # Load the initial state into the carried scratch on the first step only.
    @pl.when(t == 0)
    def _():
        h_scr[...] = h0_ref[...].astype(jnp.float32)
        c_scr[...] = c0_ref[...].astype(jnp.float32)
        o_scr[...] = o0_ref[...].astype(jnp.float32)

    h_prev = h_scr[...]
    c_prev = c_scr[...]
    o_prev = o_scr[...]
    x_t = x_ref[0]                       # (B, input_size) slice of the (1, B, In) block

    # Split matmul (no concat): xh @ W == h @ W_h + x @ W_x.
    # bf16 MXU inputs, f32 accumulation.
    w_dtype = wh_ref.dtype
    ifog = (
        jnp.dot(h_prev.astype(w_dtype), wh_ref[...],
                preferred_element_type=jnp.float32)
        + jnp.dot(x_t.astype(w_dtype), wx_ref[...],
                  preferred_element_type=jnp.float32)
        + b_ref[...].astype(jnp.float32)
    )

    H = hidden_size
    i = jax.nn.sigmoid(ifog[:, 0 * H:1 * H])
    f = jax.nn.sigmoid(ifog[:, 1 * H:2 * H])
    o = jax.nn.sigmoid(ifog[:, 2 * H:3 * H])
    g = jnp.tanh(ifog[:, 3 * H:4 * H])

    # Eval branch of ZoneoutLSTMCell.forward:
    #   c = f * c_ + (1 - p) * i * g
    #   h = (p * o + (1 - p) * o_) * tanh(c)
    c = f * c_prev + (1.0 - p) * i * g
    h = (p * o + (1.0 - p) * o_prev) * jnp.tanh(c)

    # Carry state for next step (stays in VMEM; never round-trips HBM).
    h_scr[...] = h
    c_scr[...] = c
    o_scr[...] = o

    # Per-step outputs (lane-dense: last dim = H, a multiple of 128).
    h_out_ref[0] = h.astype(h_out_ref.dtype)
    c_out_ref[0] = c.astype(c_out_ref.dtype)
    o_out_ref[0] = o.astype(o_out_ref.dtype)


def zoneout_lstm_sequence(x_seq, state, W_gates, b_gates, *, p=0.5,
                          weight_dtype=jnp.bfloat16):
    """Run T timesteps of the ZoneoutLSTMCell in a single fused pallas_call.

    x_seq: (T, B, input_size); state = (h0, c0, o0), each (B, hidden).
    Returns (h_seq, (h_T, c_T, o_T)) with h_seq/c_seq/o_seq of shape (T, B, hidden).
    """
    h0, c0, o0 = state
    T_steps, B, input_size = x_seq.shape
    H = h0.shape[1]
    assert W_gates.shape == (input_size + H, 4 * H)

    # Split W once at call time: rows [:H] act on h_, rows [H:] act on x
    # (matches xh = cat([h_, x], 1) in the PyTorch module). Cast weights to bf16.
    W_h = W_gates[:H].astype(weight_dtype)
    W_x = W_gates[H:].astype(weight_dtype)
    b2d = b_gates.reshape(1, 4 * H).astype(jnp.float32)

    kernel = functools.partial(_zoneout_lstm_seq_kernel, hidden_size=H, p=p)

    out_dtype = x_seq.dtype
    seq_sds = jax.ShapeDtypeStruct((T_steps, B, H), out_dtype)

    # Constant index_map -> block stays resident in VMEM for the whole grid
    # (weights / bias / initial state are DMA'd exactly once).
    resident = lambda shape: pl.BlockSpec(shape, lambda t, _s=shape: (0,) * len(_s))
    per_step_in = pl.BlockSpec((1, B, input_size), lambda t: (t, 0, 0))
    per_step_out = pl.BlockSpec((1, B, H), lambda t: (t, 0, 0))

    h_seq, c_seq, o_seq = pl.pallas_call(
        kernel,
        out_shape=(seq_sds, seq_sds, seq_sds),
        grid=(T_steps,),
        in_specs=[
            per_step_in,            # x_seq, streamed one timestep per grid step
            resident(W_h.shape),    # weights resident in VMEM
            resident(W_x.shape),
            resident(b2d.shape),
            resident(h0.shape),     # initial state, read only at t == 0
            resident(c0.shape),
            resident(o0.shape),
        ],
        out_specs=(per_step_out, per_step_out, per_step_out),
        scratch_shapes=[pltpu.VMEM((B, H), jnp.float32)] * 3,   # h/c/o carry
        compiler_params=pltpu.CompilerParams(
            dimension_semantics=("arbitrary",)),                 # sequential recurrence
    )(x_seq, W_h, W_x, b2d, h0, c0, o0)

    return h_seq, (h_seq[-1], c_seq[-1], o_seq[-1])


def zoneout_lstm_cell(x, state, W_gates, b_gates, *, p=0.5,
                      weight_dtype=jnp.bfloat16):
    """Single-step forward matching the PyTorch module: returns (h, (h, c, o)).

    Thin wrapper over the fused sequence kernel with T=1. If calling this in a
    Python loop over timesteps, prefer zoneout_lstm_sequence (one kernel for the
    whole sequence). input_output_aliases on the state buffers would be the next
    small win for the per-step path, but is irrelevant once the recurrence is fused.
    """
    h_seq, (h, c, o) = zoneout_lstm_sequence(
        x[None], state, W_gates, b_gates, p=p, weight_dtype=weight_dtype)
    return h_seq[0], (h, c, o)


# ----------------------------- pure-JAX reference -----------------------------

def _ref_step(x, state, W_h, W_x, b_gates, *, p, weight_dtype):
    h_, c_, o_ = state
    H = h_.shape[1]
    ifog = (jnp.dot(h_.astype(weight_dtype), W_h.astype(weight_dtype),
                    preferred_element_type=jnp.float32)
            + jnp.dot(x.astype(weight_dtype), W_x.astype(weight_dtype),
                      preferred_element_type=jnp.float32)
            + b_gates[None, :].astype(jnp.float32))
    i = jax.nn.sigmoid(ifog[:, 0 * H:1 * H])
    f = jax.nn.sigmoid(ifog[:, 1 * H:2 * H])
    o = jax.nn.sigmoid(ifog[:, 2 * H:3 * H])
    g = jnp.tanh(ifog[:, 3 * H:4 * H])
    c = f * c_ + (1.0 - p) * i * g
    h = (p * o + (1.0 - p) * o_) * jnp.tanh(c)
    return h, (h, c, o)


def zoneout_lstm_ref_sequence(x_seq, state, W_gates, b_gates, *, p=0.5,
                              weight_dtype=jnp.bfloat16):
    H = state[0].shape[1]
    W_h, W_x = W_gates[:H], W_gates[H:]

    def step(carry, x):
        h, new_state = _ref_step(x, carry, W_h, W_x, b_gates,
                                 p=p, weight_dtype=weight_dtype)
        return new_state, (h, new_state[1], new_state[2])

    final_state, (hs, cs, os_) = jax.lax.scan(step, state, x_seq)
    return hs, cs, os_, final_state


# ---------------------------------- demo ----------------------------------

if __name__ == "__main__":
    B = 8
    input_size = 64
    hidden_size = 128       # multiple of 128: gate slices & outputs lane-aligned
    T_steps = 8
    p = 0.5

    key = jax.random.PRNGKey(0)
    kx, kh, kc, kw = jax.random.split(key, 4)

    x_seq = jax.random.normal(kx, (T_steps, B, input_size), dtype=jnp.float32)
    h0 = jax.random.normal(kh, (B, hidden_size), dtype=jnp.float32)
    c0 = jax.random.normal(kc, (B, hidden_size), dtype=jnp.float32)
    o0 = jnp.ones((B, hidden_size), dtype=jnp.float32)   # matches zero_state()'s ones
    state = (h0, c0, o0)

    # Deterministic parameter init (same shapes as the PyTorch module __init__).
    W_gates = 0.1 * jax.random.normal(
        kw, (input_size + hidden_size, 4 * hidden_size), dtype=jnp.float32)
    b_gates = jnp.zeros((4 * hidden_size,), dtype=jnp.float32)

    # Fused whole-sequence kernel (primary path).
    h_seq, (h_T, c_T, o_T) = zoneout_lstm_sequence(
        x_seq, state, W_gates, b_gates, p=p)
    jax.block_until_ready((h_seq, h_T, c_T, o_T))

    # Reference scan with matching bf16-weight / f32-accumulate numerics.
    h_ref, c_ref, o_ref, (hT_ref, cT_ref, oT_ref) = zoneout_lstm_ref_sequence(
        x_seq, state, W_gates, b_gates, p=p)

    assert jnp.allclose(h_seq, h_ref, atol=1e-3, rtol=1e-3)
    assert jnp.allclose(c_T, cT_ref, atol=1e-3, rtol=1e-3)
    assert jnp.allclose(o_T, oT_ref, atol=1e-3, rtol=1e-3)

    # Single-step API matching the PyTorch module's forward signature.
    h1, (h1b, c1, o1) = zoneout_lstm_cell(x_seq[0], state, W_gates, b_gates, p=p)
    jax.block_until_ready((h1, c1, o1))
    assert jnp.allclose(h1, h_ref[0], atol=1e-3, rtol=1e-3)
    assert jnp.allclose(c1, c_ref[0], atol=1e-3, rtol=1e-3)
    assert jnp.allclose(o1, o_ref[0], atol=1e-3, rtol=1e-3)

    print("KERNEL_OK")
</pallas_src>

<mosaic_0001>
module attributes {stable_mosaic.version = 11 : i64} {
  func.func @_zoneout_lstm_seq_kernel(%arg0: i32, %arg1: memref<1x8x64xf32, #tpu.memory_space<vmem>>, %arg2: memref<128x512xbf16, #tpu.memory_space<vmem>>, %arg3: memref<64x512xbf16, #tpu.memory_space<vmem>>, %arg4: memref<1x512xf32, #tpu.memory_space<vmem>>, %arg5: memref<8x128xf32, #tpu.memory_space<vmem>>, %arg6: memref<8x128xf32, #tpu.memory_space<vmem>>, %arg7: memref<8x128xf32, #tpu.memory_space<vmem>>, %arg8: memref<1x8x128xf32, #tpu.memory_space<vmem>>, %arg9: memref<1x8x128xf32, #tpu.memory_space<vmem>>, %arg10: memref<1x8x128xf32, #tpu.memory_space<vmem>>, %arg11: memref<8x128xf32, #tpu.memory_space<vmem>>, %arg12: memref<8x128xf32, #tpu.memory_space<vmem>>, %arg13: memref<8x128xf32, #tpu.memory_space<vmem>>) attributes {dimension_semantics = [#tpu.dimension_semantics<arbitrary>], iteration_bounds = array<i64: 8>, scalar_prefetch = 0 : i64, scratch_operands = 3 : i64, tpu.core_type = #tpu.core_type<tc>, window_params = [{transform_indices = @transform_0, window_bounds = array<i64: 1, 8, 64>}, {pipeline_mode = #tpu.pipeline_mode<synchronous>, transform_indices = @transform_1, window_bounds = array<i64: 128, 512>}, {pipeline_mode = #tpu.pipeline_mode<synchronous>, transform_indices = @transform_2, window_bounds = array<i64: 64, 512>}, {pipeline_mode = #tpu.pipeline_mode<synchronous>, transform_indices = @transform_3, window_bounds = array<i64: 1, 512>}, {pipeline_mode = #tpu.pipeline_mode<synchronous>, transform_indices = @transform_4, window_bounds = array<i64: 8, 128>}, {pipeline_mode = #tpu.pipeline_mode<synchronous>, transform_indices = @transform_5, window_bounds = array<i64: 8, 128>}, {pipeline_mode = #tpu.pipeline_mode<synchronous>, transform_indices = @transform_6, window_bounds = array<i64: 8, 128>}, {transform_indices = @transform_7, window_bounds = array<i64: 1, 8, 128>}, {transform_indices = @transform_8, window_bounds = array<i64: 1, 8, 128>}, {transform_indices = @transform_9, window_bounds = array<i64: 1, 8, 128>}]} {
    %c0_i32 = arith.constant 0 : i32
    %0 = arith.cmpi eq, %arg0, %c0_i32 : i32
    %1 = arith.extui %0 : i1 to i32
    %c0_i32_0 = arith.constant 0 : i32
    %2 = arith.cmpi ne, %1, %c0_i32_0 : i32
    scf.if %2 {
      %c0_37 = arith.constant 0 : index
      %c0_38 = arith.constant 0 : index
      %62 = vector.load %arg5[%c0_37, %c0_38] : memref<8x128xf32, #tpu.memory_space<vmem>>, vector<8x128xf32>
      %c0_39 = arith.constant 0 : index
      %c0_40 = arith.constant 0 : index
      %63 = vector.load %arg11[%c0_39, %c0_40] : memref<8x128xf32, #tpu.memory_space<vmem>>, vector<8x128xf32>
      tpu.vector_store %arg11[%c0_39, %c0_40], %62 {strides = array<i32>} : memref<8x128xf32, #tpu.memory_space<vmem>>, vector<8x128xf32>,
      %c0_41 = arith.constant 0 : index
      %c0_42 = arith.constant 0 : index
      %64 = vector.load %arg6[%c0_41, %c0_42] : memref<8x128xf32, #tpu.memory_space<vmem>>, vector<8x128xf32>
      %c0_43 = arith.constant 0 : index
      %c0_44 = arith.constant 0 : index
      %65 = vector.load %arg12[%c0_43, %c0_44] : memref<8x128xf32, #tpu.memory_space<vmem>>, vector<8x128xf32>
      tpu.vector_store %arg12[%c0_43, %c0_44], %64 {strides = array<i32>} : memref<8x128xf32, #tpu.memory_space<vmem>>, vector<8x128xf32>,
      %c0_45 = arith.constant 0 : index
      %c0_46 = arith.constant 0 : index
      %66 = vector.load %arg7[%c0_45, %c0_46] : memref<8x128xf32, #tpu.memory_space<vmem>>, vector<8x128xf32>
      %c0_47 = arith.constant 0 : index
      %c0_48 = arith.constant 0 : index
      %67 = vector.load %arg13[%c0_47, %c0_48] : memref<8x128xf32, #tpu.memory_space<vmem>>, vector<8x128xf32>
      tpu.vector_store %arg13[%c0_47, %c0_48], %66 {strides = array<i32>} : memref<8x128xf32, #tpu.memory_space<vmem>>, vector<8x128xf32>,
    } else {
    }
    %c0 = arith.constant 0 : index
    %c0_1 = arith.constant 0 : index
    %3 = vector.load %arg11[%c0, %c0_1] : memref<8x128xf32, #tpu.memory_space<vmem>>, vector<8x128xf32>
    %c0_2 = arith.constant 0 : index
    %c0_3 = arith.constant 0 : index
    %4 = vector.load %arg12[%c0_2, %c0_3] : memref<8x128xf32, #tpu.memory_space<vmem>>, vector<8x128xf32>
    %c0_4 = arith.constant 0 : index
    %c0_5 = arith.constant 0 : index
    %5 = vector.load %arg13[%c0_4, %c0_5] : memref<8x128xf32, #tpu.memory_space<vmem>>, vector<8x128xf32>
    %c0_6 = arith.constant 0 : index
    %c0_7 = arith.constant 0 : index
    %c0_8 = arith.constant 0 : index
    %6 = vector.load %arg1[%c0_6, %c0_7, %c0_8] : memref<1x8x64xf32, #tpu.memory_space<vmem>>, vector<1x8x64xf32>
    %7 = vector.shape_cast %6 : vector<1x8x64xf32> to vector<8x64xf32>
    %8 = arith.truncf %3 : vector<8x128xf32> to vector<8x128xbf16>
    %c0_9 = arith.constant 0 : index
    %c0_10 = arith.constant 0 : index
    %9 = vector.load %arg2[%c0_9, %c0_10] : memref<128x512xbf16, #tpu.memory_space<vmem>>, vector<128x512xbf16>
    %cst = arith.constant dense<0.000000e+00> : vector<8x512xf32>
    %10 = tpu.matmul %8, %9, %cst {dimension_numbers = #tpu.dot_dimension_numbers<[1], [0], [0], [1], [0, 0, 1, 1], [], []>} : vector<8x128xbf16>, vector<128x512xbf16>, vector<8x512xf32> -> vector<8x512xf32>
    %11 = arith.truncf %7 : vector<8x64xf32> to vector<8x64xbf16>
    %c0_11 = arith.constant 0 : index
    %c0_12 = arith.constant 0 : index
    %12 = vector.load %arg3[%c0_11, %c0_12] : memref<64x512xbf16, #tpu.memory_space<vmem>>, vector<64x512xbf16>
    %cst_13 = arith.constant dense<0.000000e+00> : vector<8x512xf32>
    %13 = tpu.matmul %11, %12, %cst_13 {dimension_numbers = #tpu.dot_dimension_numbers<[1], [0], [0], [1], [0, 0, 1, 1], [], []>} : vector<8x64xbf16>, vector<64x512xbf16>, vector<8x512xf32> -> vector<8x512xf32>
    %14 = arith.addf %10, %13 : vector<8x512xf32>
    %c0_14 = arith.constant 0 : index
    %c0_15 = arith.constant 0 : index
    %15 = vector.load %arg4[%c0_14, %c0_15] : memref<1x512xf32, #tpu.memory_space<vmem>>, vector<1x512xf32>
    %16 = vector.broadcast %15 : vector<1x512xf32> to vector<8x512xf32>
    %17 = arith.addf %14, %16 : vector<8x512xf32>
    %18 = vector.extract_strided_slice %17 {offsets = [0, 0], sizes = [8, 128], strides = [1, 1]} : vector<8x512xf32> to vector<8x128xf32>
    %19 = arith.negf %18 : vector<8x128xf32>
    %20 = math.exp %19 : vector<8x128xf32>
    %cst_16 = arith.constant 1.000000e+00 : f32
    %21 = vector.broadcast %cst_16 : f32 to vector<8x128xf32>
    %22 = arith.addf %21, %20 : vector<8x128xf32>
    %23 = arith.divf %21, %22 : vector<8x128xf32>
    %24 = vector.extract_strided_slice %17 {offsets = [0, 128], sizes = [8, 128], strides = [1, 1]} : vector<8x512xf32> to vector<8x128xf32>
    %25 = arith.negf %24 : vector<8x128xf32>
    %26 = math.exp %25 : vector<8x128xf32>
    %cst_17 = arith.constant 1.000000e+00 : f32
    %27 = vector.broadcast %cst_17 : f32 to vector<8x128xf32>
    %28 = arith.addf %27, %26 : vector<8x128xf32>
    %29 = arith.divf %27, %28 : vector<8x128xf32>
    %30 = vector.extract_strided_slice %17 {offsets = [0, 256], sizes = [8, 128], strides = [1, 1]} : vector<8x512xf32> to vector<8x128xf32>
    %31 = arith.negf %30 : vector<8x128xf32>
    %32 = math.exp %31 : vector<8x128xf32>
    %cst_18 = arith.constant 1.000000e+00 : f32
    %33 = vector.broadcast %cst_18 : f32 to vector<8x128xf32>
    %34 = arith.addf %33, %32 : vector<8x128xf32>
    %35 = arith.divf %33, %34 : vector<8x128xf32>
    %36 = vector.extract_strided_slice %17 {offsets = [0, 384], sizes = [8, 128], strides = [1, 1]} : vector<8x512xf32> to vector<8x128xf32>
    %37 = math.tanh %36 : vector<8x128xf32>
    %38 = arith.mulf %29, %4 : vector<8x128xf32>
    %cst_19 = arith.constant 5.000000e-01 : f32
    %39 = vector.broadcast %cst_19 : f32 to vector<8x128xf32>
    %40 = arith.mulf %39, %23 : vector<8x128xf32>
    %41 = arith.mulf %40, %37 : vector<8x128xf32>
    %42 = arith.addf %38, %41 : vector<8x128xf32>
    %cst_20 = arith.constant 5.000000e-01 : f32
    %43 = vector.broadcast %cst_20 : f32 to vector<8x128xf32>
    %44 = arith.mulf %43, %35 : vector<8x128xf32>
    %cst_21 = arith.constant 5.000000e-01 : f32
    %45 = vector.broadcast %cst_21 : f32 to vector<8x128xf32>
    %46 = arith.mulf %45, %5 : vector<8x128xf32>
    %47 = arith.addf %44, %46 : vector<8x128xf32>
    %48 = math.tanh %42 : vector<8x128xf32>
    %49 = arith.mulf %47, %48 : vector<8x128xf32>
    %c0_22 = arith.constant 0 : index
    %c0_23 = arith.constant 0 : index
    %50 = vector.load %arg11[%c0_22, %c0_23] : memref<8x128xf32, #tpu.memory_space<vmem>>, vector<8x128xf32>
    tpu.vector_store %arg11[%c0_22, %c0_23], %49 {strides = array<i32>} : memref<8x128xf32, #tpu.memory_space<vmem>>, vector<8x128xf32>,
    %c0_24 = arith.constant 0 : index
    %c0_25 = arith.constant 0 : index
    %51 = vector.load %arg12[%c0_24, %c0_25] : memref<8x128xf32, #tpu.memory_space<vmem>>, vector<8x128xf32>
    tpu.vector_store %arg12[%c0_24, %c0_25], %42 {strides = array<i32>} : memref<8x128xf32, #tpu.memory_space<vmem>>, vector<8x128xf32>,
    %c0_26 = arith.constant 0 : index
    %c0_27 = arith.constant 0 : index
    %52 = vector.load %arg13[%c0_26, %c0_27] : memref<8x128xf32, #tpu.memory_space<vmem>>, vector<8x128xf32>
    tpu.vector_store %arg13[%c0_26, %c0_27], %35 {strides = array<i32>} : memref<8x128xf32, #tpu.memory_space<vmem>>, vector<8x128xf32>,
    %c0_28 = arith.constant 0 : index
    %c0_29 = arith.constant 0 : index
    %c0_30 = arith.constant 0 : index
    %53 = vector.load %arg8[%c0_28, %c0_29, %c0_30] : memref<1x8x128xf32, #tpu.memory_space<vmem>>, vector<1x8x128xf32>
    %54 = vector.shape_cast %53 : vector<1x8x128xf32> to vector<8x128xf32>
    %55 = vector.shape_cast %49 : vector<8x128xf32> to vector<1x8x128xf32>
    tpu.vector_store %arg8[%c0_28, %c0_29, %c0_30], %55 {strides = array<i32>} : memref<1x8x128xf32, #tpu.memory_space<vmem>>, vector<1x8x128xf32>,
    %c0_31 = arith.constant 0 : index
    %c0_32 = arith.constant 0 : index
    %c0_33 = arith.constant 0 : index
    %56 = vector.load %arg9[%c0_31, %c0_32, %c0_33] : memref<1x8x128xf32, #tpu.memory_space<vmem>>, vector<1x8x128xf32>
    %57 = vector.shape_cast %56 : vector<1x8x128xf32> to vector<8x128xf32>
    %58 = vector.shape_cast %42 : vector<8x128xf32> to vector<1x8x128xf32>
    tpu.vector_store %arg9[%c0_31, %c0_32, %c0_33], %58 {strides = array<i32>} : memref<1x8x128xf32, #tpu.memory_space<vmem>>, vector<1x8x128xf32>,
    %c0_34 = arith.constant 0 : index
    %c0_35 = arith.constant 0 : index
    %c0_36 = arith.constant 0 : index
    %59 = vector.load %arg10[%c0_34, %c0_35, %c0_36] : memref<1x8x128xf32, #tpu.memory_space<vmem>>, vector<1x8x128xf32>
    %60 = vector.shape_cast %59 : vector<1x8x128xf32> to vector<8x128xf32>
    %61 = vector.shape_cast %35 : vector<8x128xf32> to vector<1x8x128xf32>
    tpu.vector_store %arg10[%c0_34, %c0_35, %c0_36], %61 {strides = array<i32>} : memref<1x8x128xf32, #tpu.memory_space<vmem>>, vector<1x8x128xf32>,
    return
  }
  func.func @transform_0(%arg0: i32) -> (i32, i32, i32) {
    %c0_i32 = arith.constant 0 : i32
    %c0_i32_0 = arith.constant 0 : i32
    %c0_i32_1 = arith.constant 0 : i32
    return %arg0, %c0_i32, %c0_i32_0 : i32, i32, i32
  }
  func.func @transform_1(%arg0: i32) -> (i32, i32) {
    %c0_i32 = arith.constant 0 : i32
    %c0_i32_0 = arith.constant 0 : i32
    %c0_i32_1 = arith.constant 0 : i32
    return %c0_i32, %c0_i32_0 : i32, i32
  }
  func.func @transform_2(%arg0: i32) -> (i32, i32) {
    %c0_i32 = arith.constant 0 : i32
    %c0_i32_0 = arith.constant 0 : i32
    %c0_i32_1 = arith.constant 0 : i32
    return %c0_i32, %c0_i32_0 : i32, i32
  }
  func.func @transform_3(%arg0: i32) -> (i32, i32) {
    %c0_i32 = arith.constant 0 : i32
    %c0_i32_0 = arith.constant 0 : i32
    %c0_i32_1 = arith.constant 0 : i32
    return %c0_i32, %c0_i32_0 : i32, i32
  }
  func.func @transform_4(%arg0: i32) -> (i32, i32) {
    %c0_i32 = arith.constant 0 : i32
    %c0_i32_0 = arith.constant 0 : i32
    %c0_i32_1 = arith.constant 0 : i32
    return %c0_i32, %c0_i32_0 : i32, i32
  }
  func.func @transform_5(%arg0: i32) -> (i32, i32) {
    %c0_i32 = arith.constant 0 : i32
    %c0_i32_0 = arith.constant 0 : i32
    %c0_i32_1 = arith.constant 0 : i32
    return %c0_i32, %c0_i32_0 : i32, i32
  }
  func.func @transform_6(%arg0: i32) -> (i32, i32) {
    %c0_i32 = arith.constant 0 : i32
    %c0_i32_0 = arith.constant 0 : i32
    %c0_i32_1 = arith.constant 0 : i32
    return %c0_i32, %c0_i32_0 : i32, i32
  }
  func.func @transform_7(%arg0: i32) -> (i32, i32, i32) {
    %c0_i32 = arith.constant 0 : i32
    %c0_i32_0 = arith.constant 0 : i32
    %c0_i32_1 = arith.constant 0 : i32
    return %arg0, %c0_i32, %c0_i32_0 : i32, i32, i32
  }
  func.func @transform_8(%arg0: i32) -> (i32, i32, i32) {
    %c0_i32 = arith.constant 0 : i32
    %c0_i32_0 = arith.constant 0 : i32
    %c0_i32_1 = arith.constant 0 : i32
    return %arg0, %c0_i32, %c0_i32_0 : i32, i32, i32
  }
  func.func @transform_9(%arg0: i32) -> (i32, i32, i32) {
    %c0_i32 = arith.constant 0 : i32
    %c0_i32_0 = arith.constant 0 : i32
    %c0_i32_1 = arith.constant 0 : i32
    return %arg0, %c0_i32, %c0_i32_0 : i32, i32, i32
  }
}

</mosaic_0001>

<bundles_post_ra>
// kernel: tpu_custom_call.1
= control target key start
LH: loop header
LB: loop body
LE: loop exit
PB: predicated region body
PF: predicated region fallthrough
CT: control target
= control target key end

     0   :  { %s2170_s0 = inlined_call_operand.hbm [shape: f32[8,8,64], index: 0, kind: input, shape index: {}]   ;;  %s2171_s1 = inlined_call_operand.hbm [shape: bf16[128,512], index: 1, kind: input, shape index: {}]   ;;  %s2172_s2 = inlined_call_operand.hbm [shape: bf16[64,512], index: 2, kind: input, shape index: {}]   ;;  %s2173_s3 = inlined_call_operand.hbm [shape: f32[1,512], index: 3, kind: input, shape index: {}]   ;;  %s2174_s4 = inlined_call_operand.vmem [shape: f32[8,128], index: 4, kind: input, shape index: {}]   ;;  %s2175_s5 = inlined_call_operand.vmem [shape: f32[8,128], index: 5, kind: input, shape index: {}]   ;;  %s2176_s6 = inlined_call_operand.hbm [shape: f32[8,128], index: 6, kind: input, shape index: {}]   ;;  %s2177_s7 = inlined_call_operand.hbm [shape: f32[8,8,128], index: 7, kind: output, shape index: {0}]   ;;  %s2178_s8 = inlined_call_operand.hbm [shape: f32[8,8,128], index: 8, kind: output, shape index: {1}]   ;;  %s2179_s9 = inlined_call_operand.hbm [shape: f32[8,8,128], index: 9, kind: output, shape index: {2}]  }
   0x1   :  { %2185 = sst [smem:[#allocation23_spill]] %s2170_s0 }
   0x2   :  { %2186 = sst [smem:[#allocation24_spill]] %s2171_s1 }
   0x3   :  { %2187 = sst [smem:[#allocation25_spill]] %s2177_s7 }
   0x4   :  { %15 = vsyncpa [#allocation6], 0 }
   0x5   :  { %17 = vsyncpa [#allocation6 + $0x1], 0 }
   0x6   :  { %18 = vsyncpa [#allocation9], 0 }
   0x7   :  { %19 = vsyncpa [#allocation12], 0 }
   0x8   :  { %20 = vsyncpa [#allocation7], 0 }
   0x9   :  { %22 = vsyncpa [#allocation7 + $0x1], 0 }
   0xa   :  { %23 = vsyncpa [#allocation16], 0 }
   0xb   :  { %25 = vsyncpa [#allocation16 + $0x1], 0  ;;  %s1779_s30 = smov 0   ;;  %s1781_s10 = smov 0  }
   0xc   :  { %s1783_s11 = smov 0   ;;  %s1785_s12 = smov 0  }
   0xd LB: > { %s1718_s13 = smov [#allocation8]   ;;  %s1800_s15 = sadd.s32 4294967295, %s1716_s12   ;;  %s1716_s12 = sphi %s1785_s12, %s2214_s12   ;;  %s1712_s11 = sphi %s1783_s11, %s2213_s11   ;;  %s1708_s10 = sphi %s1781_s10, %s2212_s10   ;;  %s1704_s30 = sphi %s1779_s30, %s2211_s30  }
   0xe   : > { %s278_s14 = sshll.u32 %s1718_s13, 4  ;;  %p1173_p0 = scmp.ge.s32.totalorder %s1716_s12, 1  ;;  %s1806_s14 = int_to_ptr.vmem [resolvable:$true] %s278_s14 }
   0xf   : > { %p2181_p1 = scmp.eq.s32.totalorder %s1800_s15, 0  ;;  %p266_p2 = scmp.lt.s32.totalorder %s1716_s12, 9 }
  0x10   : > { %s1719_s17 = smov [#allocation11]   ;;  %s1720_s20 = smov [#allocation10]  }
  0x11   : > { %p1808_p4 = pnand %p1173_p0, %p266_p2  ;;  %s305_s18 = sshll.u32 %s1719_s17, 4  ;;  %s1820_s18 = int_to_ptr.vmem [resolvable:$true] %s305_s18 }
  0x12   : > { %s291_s21 = sshll.u32 %s1720_s20, 4  ;;  %s2190_s1 = sld [smem:[#allocation24_spill]]  ;;  %s1822_s21 = int_to_ptr.vmem [resolvable:$true] %s291_s21 }
  0x13   : > { %s2188_s16 = scalar_select %p1808_p4, 1, 0 }
  0x14   : > { %p1276_p5 = pneg %p1808_p4 }
  0x16   : > { %p1816_p6 = pnand %p1276_p5, %p2181_p1 }
  0x18   : > { %s1440_s24 = scalar_lea.hbm %s2190_s1, 4096  ;;  %p1832_p8 = pneg %p1816_p6 }
  0x19   : > { %p1441_p7 = scmp.ne.s32.totalorder %s2190_s1, %s1440_s24  ;;  %p1447_p11 = scmp.lt.u32.totalorder %s1440_s24, %s2190_s1 }
  0x1b   : > { %p1443_p9 = pnand %p1832_p8, %p1441_p7 }
  0x1d   : > { %p1444_p10 = pneg %p1443_p9 }
  0x1f   : > { %p1449_p12 = pnand %p1447_p11, %p1444_p10 }
  0x21   : > { %1452 = shalt.err (!%p1449_p12)
}
  0x22   : > { %s1453_s13 = scalar_lea.vmem %s1806_s14, 4096  ;;  %p1461_p5 = scmp.lt.s32.totalorder %s1806_s14, %s1806_s14 }
  0x23   : > { %p1454_p13 = scmp.ne.s32.totalorder %s1806_s14, %s1453_s13  ;;  %p1462_p3 = scmp.lt.s32.totalorder %s1453_s13, %s1453_s13 }
  0x25   : > { %p1456_p0 = pnand %p1454_p13, %p1832_p8  ;;  %p1463_p7 = por %p1462_p3, %p1461_p5 }
  0x27   : > { %p1457_p2 = pneg %p1456_p0 }
  0x29   : > { %p1464_p9 = pnand %p1463_p7, %p1457_p2 }
  0x2b   : > { %1467 = shalt.err (!%p1464_p9)
}
  0x2c   : > { %s1721_s17 = smov 256   ;;  %s1722_s20 = smov 16  }
  0x2d   : > { %1279 = dma.hbm_to_vmem [thread:$0]  (!%p1816_p6), %s2190_s1, 4096, %s1806_s14, [#allocation9], %s1721_s17, %s1721_s17, %s1722_s20  }
  0x2e   : > { %s1468_s26 = scalar_lea.hbm %s2173_s3, 64 }
  0x2f   : > { %p1469_p3 = scmp.ne.s32.totalorder %s2173_s3, %s1468_s26  ;;  %p1475_p12 = scmp.lt.u32.totalorder %s1468_s26, %s2173_s3 }
  0x31   : > { %p1471_p10 = pnand %p1469_p3, %p1832_p8 }
  0x33   : > { %p1472_p11 = pneg %p1471_p10 }
  0x35   : > { %p1477_p13 = pnand %p1475_p12, %p1472_p11 }
  0x37   : > { %1480 = shalt.err (!%p1477_p13)
}
  0x38   : > { %s1481_s14 = scalar_lea.vmem %s1820_s18, 64  ;;  %p1489_p7 = scmp.lt.s32.totalorder %s1820_s18, %s1820_s18 }
  0x39   : > { %p1482_p0 = scmp.ne.s32.totalorder %s1820_s18, %s1481_s14  ;;  %p1490_p9 = scmp.lt.s32.totalorder %s1481_s14, %s1481_s14 }
  0x3b   : > { %p1484_p2 = pnand %p1482_p0, %p1832_p8  ;;  %p1491_p3 = por %p1490_p9, %p1489_p7 }
  0x3d   : > { %p1485_p5 = pneg %p1484_p2 }
  0x3f   : > { %p1492_p10 = pnand %p1491_p3, %p1485_p5 }
  0x41   : > { %1495 = shalt.err (!%p1492_p10)
}
  0x42   : > { %1285 = dma.hbm_to_vmem [thread:$0]  (!%p1816_p6), %s2173_s3, 64, %s1820_s18, [#allocation12]  }
  0x43   : > { %s1496_s25 = scalar_lea.hbm %s2172_s2, 2048 }
  0x44   : > { %p1497_p11 = scmp.ne.s32.totalorder %s2172_s2, %s1496_s25  ;;  %p1503_p0 = scmp.lt.u32.totalorder %s1496_s25, %s2172_s2 }
  0x46   : > { %p1499_p12 = pnand %p1497_p11, %p1832_p8 }
  0x48   : > { %p1500_p13 = pneg %p1499_p12 }
  0x4a   : > { %p1505_p2 = pnand %p1503_p0, %p1500_p13 }
  0x4c   : > { %1508 = shalt.err (!%p1505_p2)
}
  0x4d   : > { %s1509_s18 = scalar_lea.vmem %s1822_s21, 2048  ;;  %p1517_p3 = scmp.lt.s32.totalorder %s1822_s21, %s1822_s21 }
  0x4e   : > { %p1510_p5 = scmp.ne.s32.totalorder %s1822_s21, %s1509_s18  ;;  %p1518_p10 = scmp.lt.s32.totalorder %s1509_s18, %s1509_s18 }
  0x50   : > { %p1512_p7 = pnand %p1510_p5, %p1832_p8  ;;  %p1519_p11 = por %p1518_p10, %p1517_p3 }
  0x52   : > { %p1513_p9 = pneg %p1512_p7 }
  0x54   : > { %p1520_p12 = pnand %p1519_p11, %p1513_p9 }
  0x56   : > { %1523 = shalt.err (!%p1520_p12)
}
  0x57   : > { %1282 = dma.hbm_to_vmem [thread:$0]  (!%p1816_p6), %s2172_s2, 2048, %s1822_s21, [#allocation9], %s1721_s17, %s1721_s17, %s1722_s20  }
  0x58   : > { %s1723_s22 = smov [#allocation13]   ;;  %s1524_s26 = scalar_lea.hbm %s2176_s6, 128 }
  0x59   : > { %s322_s23 = sshll.u32 %s1723_s22, 4  ;;  %p1525_p13 = scmp.ne.s32.totalorder %s2176_s6, %s1524_s26  ;;  %s323_s23 = int_to_ptr.vmem [resolvable:$true] %s322_s23 }
  0x5a   : > { %p1531_p5 = scmp.lt.u32.totalorder %s1524_s26, %s2176_s6 }
  0x5b   : > { %p1527_p0 = pnand %p1525_p13, %p1832_p8 }
  0x5d   : > { %p1528_p2 = pneg %p1527_p0 }
  0x5f   : > { %p1533_p7 = pnand %p1531_p5, %p1528_p2 }
  0x61   : > { %1536 = shalt.err (!%p1533_p7)
}
  0x62   : > { %s1537_s21 = scalar_lea.vmem %s323_s23, 128  ;;  %p1545_p11 = scmp.lt.s32.totalorder %s323_s23, %s323_s23 }
  0x63   : > { %p1538_p9 = scmp.ne.s32.totalorder %s323_s23, %s1537_s21  ;;  %p1546_p12 = scmp.lt.s32.totalorder %s1537_s21, %s1537_s21 }
  0x65   : > { %p1540_p3 = pnand %p1538_p9, %p1832_p8  ;;  %p1547_p1 = por %p1546_p12, %p1545_p11 }
  0x67   : > { %p1541_p10 = pneg %p1540_p3 }
  0x69   : > { %p1548_p4 = pnand %p1547_p1, %p1541_p10 }
  0x6b   : > { %1551 = shalt.err (!%p1548_p4)
}
  0x6c   : > { %1288 = dma.hbm_to_vmem [thread:$0]  (!%p1816_p6), %s2176_s6, 128, %s323_s23, [#allocation12]  }
  0x6d   : > { %s2183_s19 = sadd.s32 4294967294, %s1716_s12   ;;  %s1925_s27 = sadd.s32 1, %s1716_s12  }
  0x6e   : > { %s35_s14 = ssub.s32 %s1716_s12, %s1925_s27  ;;  %s38_s7 = sadd.s32 1, %s1712_s11 }
  0x6f   : > { %p36_p1 = scmp.eq.s32.totalorder %s35_s14, 0  ;;  %p45_p4 = scmp.ne.s32.totalorder %s1712_s11, %s1708_s10 }
  0x70   : > { %p46_p8 = scmp.eq.s32.totalorder %s1716_s12, 0  ;;  %p51_p13 = scmp.ne.s32.totalorder %s1708_s10, %s1704_s30 }
  0x71   : > { %s1936_s22 = scalar_select %p36_p1, %s1712_s11, %s38_s7  }
  0x72   : > { %p1938_p0 = por %p46_p8, %p45_p4  ;;  %p2193_p2 = scmp.eq.s32.totalorder %s1800_s15, 0 }
  0x73   : > { %p201_p5 = scmp.eq.s32.totalorder %s1800_s15, 7  ;;  %p207_p7 = scmp.eq.s32.totalorder %s2183_s19, 7 }
  0x74   : > { %p1944_p6 = por %p2193_p2, %p51_p13  ;;  %p1307_p9 = scmp.lt.s32.totalorder %s1716_s12, 8 }
  0x75   : > { %s333_s25 = sand.u32 1, %s1712_s11   ;;  %p1953_p3 = por %p201_p5, %p45_p4 }
  0x76   : > { %p1957_p10 = por %p207_p7, %p51_p13  ;;  %s1179_s29 = sshll.u32 %s333_s25, 3 }
  0x77   : > { %s2195_s26 = scalar_select %p1953_p3, 1, 0 }
  0x78   : > { %s2196_s28 = scalar_select %p1957_p10, 1, 0 }
  0x79   : > { %s1180_s13 = sshll.u32 %s1716_s12, 7  ;;  %s2197_s0 = sld [smem:[#allocation23_spill]] }
  0x7a   : > { %s337_s20 = scalar_lea.vmem [#allocation5], %s1179_s29  ;;  %p1971_p11 = pnand %p1307_p9, %p1938_p0 }
  0x7b   : > { %s344_s14 = sshll.u32 %s337_s20, 4  ;;  %s334_s19 = scalar_lea.sflag [#allocation6], %s333_s25  ;;  %s1967_s14 = int_to_ptr.vmem [resolvable:$true] %s344_s14 }
  0x7c   : > { %p1554_p1 = pneg %p1971_p11 }
  0x7f   : > { %s1965_s17 = scalar_lea.hbm %s2197_s0, %s1180_s13  ;;  %s1557_s18 = scalar_lea.hbm %s2197_s0, 1024 }
  0x80   : > { %s1552_s1 = scalar_lea.hbm %s1965_s17, 128  ;;  %p1558_p13 = scmp.lt.u32.totalorder %s1965_s17, %s2197_s0 }
  0x81   : > { %p1553_p12 = scmp.ne.s32.totalorder %s1965_s17, %s1552_s1  ;;  %p1559_p0 = scmp.lt.u32.totalorder %s1557_s18, %s1552_s1 }
  0x82   : > { %p1561_p5 = scmp.lt.u32.totalorder %s1552_s1, %s1965_s17 }
  0x83   : > { %p1555_p4 = pnand %p1554_p1, %p1553_p12  ;;  %p1560_p2 = por %p1559_p0, %p1558_p13 }
  0x85   : > { %p1556_p8 = pneg %p1555_p4  ;;  %p1562_p7 = por %p1561_p5, %p1560_p2 }
  0x87   : > { %p1563_p9 = pnand %p1562_p7, %p1556_p8 }
  0x89   : > { %1566 = shalt.err (!%p1563_p9)
}
  0x8a   : > { %s1567_s25 = scalar_lea.vmem %s1967_s14, 128  ;;  %s1724_s20 = smov [#allocation5]  }
  0x8b   : > { %p1568_p12 = scmp.ne.s32.totalorder %s1967_s14, %s1567_s25  ;;  %s1572_s29 = sshll.u32 %s1724_s20, 4  ;;  %s1573_s29 = int_to_ptr.vmem [resolvable:$false] %s1572_s29 }
  0x8c   : > { %s1574_s13 = scalar_lea.vmem %s1573_s29, 256  ;;  %p1575_p3 = scmp.lt.s32.totalorder %s1967_s14, %s1573_s29 }
  0x8d   : > { %p1570_p4 = pnand %p1568_p12, %p1554_p1  ;;  %p1576_p13 = scmp.lt.s32.totalorder %s1574_s13, %s1567_s25 }
  0x8f   : > { %p1571_p10 = pneg %p1570_p4  ;;  %p1577_p0 = por %p1576_p13, %p1575_p3 }
  0x91   : > { %p1578_p2 = pnand %p1577_p0, %p1571_p10 }
  0x93   : > { %1581 = shalt.err (!%p1578_p2)
}
  0x94   : > { %1292 = dma.hbm_to_vmem [thread:$0]  (!%p1971_p11), %s1965_s17, 128, %s1967_s14, %s334_s19  }
  0x95   : > { %p2199_p8 = scmp.ne.s32.totalorder %s2188_s16, 0 }
  0x96   : > { %s2003_s1 = sand.u32 (!%p2199_p8), 1, %s1708_s10  }
  0x97   : > { %353 = sbr.rel (%p2199_p8) target bundleno = 535 (0x217), region = 48  ;;  %s2006_s18 = sshll.u32 (!%p2199_p8), %s2003_s1, 3 }
  0x98   : > { %s356_s24 = scalar_lea.sflag (!%p2199_p8), [#allocation6], %s2003_s1  ;;  %s359_s21 = scalar_lea.vmem (!%p2199_p8), [#allocation5], %s2006_s18 }
  0x9e   : > { %1683 = dma.done.wait (%p1944_p6), %s356_s24, 128  }
  0x9f   : > { %1685 = vsyncadd (%p1944_p6), %s356_s24, 4294967168  ;;  %p2200_p3 = scmp.eq.s32.totalorder %s1800_s15, 0 }
  0xa1   : > { %1687 = dma.done.wait (%p2200_p3), [#allocation9], 6144   ;;  %p2201_p10 = pmov %p2200_p3 }
  0xa2   : > { %p2202_p11 = pmov %p2200_p3 }
  0xa3   : > { %1689 = vsyncadd (%p2201_p10), [#allocation9], 4294961152 }
  0xa4   : > { %1691 = dma.done.wait (%p2202_p11), [#allocation12], 192   ;;  %p2203_p1 = pmov %p2200_p3 }
  0xa5   : > { %s412_s19 = scalar_lea.vmem [#allocation15], %s2006_s18  ;;  %s419_s17 = scalar_lea.vmem [#allocation17], %s2006_s18 }
  0xa6   : > { %1693 = vsyncadd (%p2203_p1), [#allocation12], 4294967104  ;;  %p2204_p6 = scmp.ne.s32.totalorder %s1800_s15, 0 }
  0xa7   : > { %v425_v0 = vld [vmem:[%s2174_s4] sm:$0xff] (!%p2204_p6)  ;;  %v429_v2 = vld [vmem:[#allocation13] sm:$0xff] (!%p2204_p6) }
  0xa8   : > { %424 = sbr.rel (%p2204_p6) target bundleno = 175 (0xaf), region = 72  ;;  %v427_v1 = vld [vmem:[%s2175_s5] sm:$0xff] (!%p2204_p6)  ;;  %426 = vst [vmem:[#allocation2] sm:$0xff] (!%p2204_p6), %v425_v0  ;;  %430 = vst [vmem:[#allocation4] sm:$0xff] (!%p2204_p6), %v429_v2 }
  0xa9   : > { %428 = vst [vmem:[#allocation3] sm:$0xff] (!%p2204_p6), %v427_v1 }
  0xaf PF: > { %v1352_v3 = vld [vmem:[#allocation10 + $0x4] ss:$16 sps:$4 sm:$0xff]   ;;  %v1354_v4 = vld [vmem:[#allocation10 + $0xc] ss:$16 sps:$4 sm:$0xff]   ;;  %v1725_v5 = vmov 0   ;;  %vm565_vm0 = vcmask 523264   ;;  %v895_v0 = vlaneseq }
  0xb0   : > { %601 = vmatprep.mubr.bf16.mxu0 %v1725_v5  ;;  %642 = vmatprep.mubr.bf16.mxu1 %v1725_v5  ;;  %v1356_v6 = vld [vmem:[#allocation10] ss:$16 sps:$4 sm:$0xff]   ;;  %v1357_v7 = vld [vmem:[#allocation10 + $0x8] ss:$16 sps:$4 sm:$0xff]   ;;  %v1358_v8 = vld [vmem:[#allocation10 + $0x24] ss:$16 sps:$4 sm:$0xff]  }
  0xb1   : > { %569 = vmatprep.subr.bf16.mxu0 %v1352_v3  ;;  %610 = vmatprep.subr.bf16.mxu1 %v1354_v4  ;;  %v1360_v9 = vld [vmem:[#allocation10 + $0x2c] ss:$16 sps:$4 sm:$0xff]   ;;  %v1362_v10 = vld [vmem:[#allocation10 + $0x20] ss:$16 sps:$4 sm:$0xff]   ;;  %v1363_v11 = vld [vmem:[#allocation10 + $0x28] ss:$16 sps:$4 sm:$0xff]  }
  0xb2   : > { %570 = vmatpush1.bf16.msra.mxu0 %v1356_v6  ;;  %611 = vmatpush1.bf16.msra.mxu1 %v1357_v7  ;;  %v1364_v12 = vld [vmem:[#allocation10 + $0x44] ss:$16 sps:$4 sm:$0xff]   ;;  %v1366_v13 = vld [vmem:[#allocation10 + $0x4c] ss:$16 sps:$4 sm:$0xff]   ;;  %v1368_v14 = vld [vmem:[#allocation10 + $0x40] ss:$16 sps:$4 sm:$0xff]  }
  0xb3   : > { %571 = vmatprep.subr.bf16.mxu0 %v1358_v8  ;;  %612 = vmatprep.subr.bf16.mxu1 %v1360_v9  ;;  %v1369_v15 = vld [vmem:[#allocation10 + $0x48] ss:$16 sps:$4 sm:$0xff]   ;;  %v1370_v16 = vld [vmem:[#allocation10 + $0x64] ss:$16 sps:$4 sm:$0xff]   ;;  %v1372_v17 = vld [vmem:[#allocation10 + $0x6c] ss:$16 sps:$4 sm:$0xff]  }
  0xb4   : > { %v1374_v18 = vld [vmem:[#allocation10 + $0x60] ss:$16 sps:$4 sm:$0xff]   ;;  %v1375_v19 = vld [vmem:[#allocation10 + $0x68] ss:$16 sps:$4 sm:$0xff]   ;;  %v1378_v21 = vld [vmem:[#allocation8 + $0x4] ss:$16 sps:$4 sm:$0xff]  }
  0xb5   : > { %v434_v20 = vld [vmem:[%s359_s21] sm:$0xff]  ;;  %v896_v1 = vshrl.u32 %v895_v0, 7  ;;  %v893_v4 = vld [vmem:[#allocation11] sm:$0xf]  ;;  %s958_s20 = sand.u32 1, %s1800_s15   ;;  %s2044_s29 = sshll.u32 %s1800_s15, 7 }
  0xb6   : > { %572 = vmatpush1.bf16.msra.mxu0 %v1362_v10  ;;  %613 = vmatpush1.bf16.msra.mxu1 %v1363_v11  ;;  %v1381_v22 = vld [vmem:[#allocation8 + $0xc] ss:$16 sps:$4 sm:$0xff]   ;;  %v468_v23 = vpack.c.bf16 %v434_v20, %v434_v20  ;;  %v1376_v24 = vld [vmem:[#allocation8] ss:$16 sps:$4 sm:$0xff]   ;;  %v1379_v25 = vld [vmem:[#allocation8 + $0x8] ss:$16 sps:$4 sm:$0xff]   ;;  %s2055_s14 = scalar_lea.hbm %s2178_s8, %s2044_s29  ;;  %s2063_s25 = scalar_lea.hbm %s2179_s9, %s2044_s29 }
  0xb7   : > { %573 = vmatprep.subr.bf16.mxu0 %v1364_v12  ;;  %614 = vmatprep.subr.bf16.mxu1 %v1366_v13  ;;  %v1384_v26 = vld [vmem:[#allocation8 + $0x24] ss:$16 sps:$4 sm:$0xff]   ;;  %v1387_v27 = vld [vmem:[#allocation8 + $0x2c] ss:$16 sps:$4 sm:$0xff]   ;;  %v1382_v28 = vld [vmem:[#allocation8 + $0x20] ss:$16 sps:$4 sm:$0xff]  }
  0xb8   : > { %v1385_v29 = vld [vmem:[#allocation8 + $0x28] ss:$16 sps:$4 sm:$0xff]   ;;  %v1390_v30 = vld [vmem:[#allocation8 + $0x44] ss:$16 sps:$4 sm:$0xff]   ;;  %v1393_v31 = vld [vmem:[#allocation8 + $0x4c] ss:$16 sps:$4 sm:$0xff]  }
  0xb9   : > { %v1388_v32 = vld [vmem:[#allocation8 + $0x40] ss:$16 sps:$4 sm:$0xff]   ;;  %v1391_v33 = vld [vmem:[#allocation8 + $0x48] ss:$16 sps:$4 sm:$0xff]   ;;  %v1396_v34 = vld [vmem:[#allocation8 + $0x64] ss:$16 sps:$4 sm:$0xff]  }
  0xba   : > { %574 = vmatpush1.bf16.msra.mxu0 %v1368_v14  ;;  %615 = vmatpush1.bf16.msra.mxu1 %v1369_v15  ;;  %v1399_v35 = vld [vmem:[#allocation8 + $0x6c] ss:$16 sps:$4 sm:$0xff]   ;;  %v1394_v36 = vld [vmem:[#allocation8 + $0x60] ss:$16 sps:$4 sm:$0xff]   ;;  %v1397_v37 = vld [vmem:[#allocation8 + $0x68] ss:$16 sps:$4 sm:$0xff]  }
  0xbb   : > { %575 = vmatprep.subr.bf16.mxu0 %v1370_v16  ;;  %616 = vmatprep.subr.bf16.mxu1 %v1372_v17  ;;  %v1402_v38 = vld [vmem:[#allocation8 + $0x84] ss:$16 sps:$4 sm:$0xff]   ;;  %v1405_v39 = vld [vmem:[#allocation8 + $0x8c] ss:$16 sps:$4 sm:$0xff]   ;;  %v1400_v40 = vld [vmem:[#allocation8 + $0x80] ss:$16 sps:$4 sm:$0xff]  }
  0xbc   : > { %v1403_v41 = vld [vmem:[#allocation8 + $0x88] ss:$16 sps:$4 sm:$0xff]   ;;  %v1408_v42 = vld [vmem:[#allocation8 + $0xa4] ss:$16 sps:$4 sm:$0xff]   ;;  %v1411_v43 = vld [vmem:[#allocation8 + $0xac] ss:$16 sps:$4 sm:$0xff]  }
  0xbd   : > { %v1406_v44 = vld [vmem:[#allocation8 + $0xa0] ss:$16 sps:$4 sm:$0xff]   ;;  %v1409_v45 = vld [vmem:[#allocation8 + $0xa8] ss:$16 sps:$4 sm:$0xff]   ;;  %v1414_v46 = vld [vmem:[#allocation8 + $0xc4] ss:$16 sps:$4 sm:$0xff]  }
  0xbe   : > { %576 = vmatpush1.bf16.msra.mxu0 %v1374_v18  ;;  %617 = vmatpush1.bf16.msra.mxu1 %v1375_v19  ;;  %v1417_v47 = vld [vmem:[#allocation8 + $0xcc] ss:$16 sps:$4 sm:$0xff]   ;;  %v1412_v48 = vld [vmem:[#allocation8 + $0xc0] ss:$16 sps:$4 sm:$0xff]   ;;  %v1415_v49 = vld [vmem:[#allocation8 + $0xc8] ss:$16 sps:$4 sm:$0xff]  }
  0xbf   : > { %811 = vmatprep.subr.bf16.mxu0 %v1378_v21  ;;  %852 = vmatprep.subr.bf16.mxu1 %v1381_v22  ;;  %v1420_v50 = vld [vmem:[#allocation8 + $0xe4] ss:$16 sps:$4 sm:$0xff]   ;;  %v1423_v51 = vld [vmem:[#allocation8 + $0xec] ss:$16 sps:$4 sm:$0xff]   ;;  %v1418_v52 = vld [vmem:[#allocation8 + $0xe0] ss:$16 sps:$4 sm:$0xff]  }
  0xc0   : > { %v1421_v53 = vld [vmem:[#allocation8 + $0xe8] ss:$16 sps:$4 sm:$0xff]   ;;  %v897_v2 = vsub.s32 0, %v896_v1  ;;  %v905_v3 = vsub.s32 2, %v896_v1  ;;  %s990_s13 = sshll.u32 %s412_s19, 4  ;;  %s1003_s24 = sshll.u32 %s419_s17, 4  ;;  %s2057_s13 = int_to_ptr.vmem [resolvable:$true] %s990_s13  ;;  %s2065_s24 = int_to_ptr.vmem [resolvable:$true] %s1003_s24 }
  0xc1   : > { %1207 = vmatmul.mubr.msk.bf16.vlgmr.msra.gmra.mrb[0].mxu0 %vm565_vm0, %v468_v23  ;;  %1208 = vmatmul.mubr.msk.bf16.vlgmr.msra.gmra.mrb[0].mxu1 %vm565_vm0, %v468_v23  ;;  %v431_v54 = vld [vmem:[#allocation2] sm:$0xff]  ;;  %s1582_s21 = scalar_lea.vmem %s2057_s13, 128  ;;  %p2205_p7 = scmp.ne.s32.totalorder %s2195_s26, 0 }
  0xc2   : > { %812 = vmatpush1.bf16.msra.mxu0 %v1376_v24  ;;  %853 = vmatpush1.bf16.msra.mxu1 %v1379_v25  ;;  %v435_v55 = vpack.c.bf16 %v431_v54, %v431_v54  ;;  %v898_v6 = vrot.slane %v893_v4, %v897_v2  ;;  %v906_v7 = vrot.slane %v893_v4, %v905_v3  ;;  %p1583_p5 = scmp.ne.s32.totalorder %s2057_s13, %s1582_s21  ;;  %s1726_s23 = smov [#allocation15]  }
  0xc3   : > { %813 = vmatprep.subr.bf16.mxu0 %v1384_v26  ;;  %854 = vmatprep.subr.bf16.mxu1 %v1387_v27  ;;  %v909_v27 = vsub.s32 3, %v896_v1  ;;  %s1586_s15 = sshll.u32 %s1726_s23, 4  ;;  %s1587_s15 = int_to_ptr.vmem [resolvable:$false] %s1586_s15 }
  0xc4   : > { %843 = vmatprep.mubr.bf16.mxu0 %v1725_v5  ;;  %884 = vmatprep.mubr.bf16.mxu1 %v1725_v5  ;;  %v901_v5 = vsub.s32 1, %v896_v1  ;;  %p1584_p9 = pnand %p1583_p5, %p2205_p7  ;;  %s1588_s7 = scalar_lea.vmem %s1587_s15, 256 }
  0xc5   : > { %p1589_p4 = scmp.lt.s32.totalorder %s2057_s13, %s1587_s15  ;;  %p1590_p13 = scmp.lt.s32.totalorder %s1588_s7, %s1582_s21 }
  0xc6   : > { %814 = vmatpush1.bf16.msra.mxu0 %v1382_v28  ;;  %855 = vmatpush1.bf16.msra.mxu1 %v1385_v29  ;;  %v902_v10 = vrot.slane %v893_v4, %v901_v5  ;;  %v910_v28 = vrot.slane %v893_v4, %v909_v27  ;;  %p1585_p12 = pneg %p1584_p9 }
  0xc7   : > { %815 = vmatprep.subr.bf16.mxu0 %v1390_v30  ;;  %856 = vmatprep.subr.bf16.mxu1 %v1393_v31  ;;  %p1591_p0 = por %p1590_p13, %p1589_p4 }
  0xc9   : > { %p1592_p2 = pnand %p1591_p0, %p1585_p12 }
  0xca   : > { %816 = vmatpush1.bf16.msra.mxu0 %v1388_v32  ;;  %857 = vmatpush1.bf16.msra.mxu1 %v1391_v33 }
  0xcb   : > { %817 = vmatprep.subr.bf16.mxu0 %v1396_v34  ;;  %858 = vmatprep.subr.bf16.mxu1 %v1399_v35 }
  0xce   : > { %818 = vmatpush1.bf16.msra.mxu0 %v1394_v36  ;;  %859 = vmatpush1.bf16.msra.mxu1 %v1397_v37  ;;  %v2035_v37 = vld [vmem:[#allocation4] sm:$0xff] }
  0xcf   : > { %819 = vmatprep.subr.bf16.mxu0 %v1402_v38  ;;  %860 = vmatprep.subr.bf16.mxu1 %v1405_v39  ;;  %v432_v39 = vld [vmem:[#allocation3] sm:$0xff] }
  0xd2   : > { %820 = vmatpush1.bf16.msra.mxu0 %v1400_v40  ;;  %861 = vmatpush1.bf16.msra.mxu1 %v1403_v41 }
  0xd3   : > { %821 = vmatprep.subr.bf16.mxu0 %v1408_v42  ;;  %862 = vmatprep.subr.bf16.mxu1 %v1411_v43 }
  0xd6   : > { %822 = vmatpush1.bf16.msra.mxu0 %v1406_v44  ;;  %863 = vmatpush1.bf16.msra.mxu1 %v1409_v45 }
  0xd7   : > { %823 = vmatprep.subr.bf16.mxu0 %v1414_v46  ;;  %864 = vmatprep.subr.bf16.mxu1 %v1417_v47 }
  0xda   : > { %824 = vmatpush1.bf16.msra.mxu0 %v1412_v48  ;;  %865 = vmatpush1.bf16.msra.mxu1 %v1415_v49 }
  0xdb   : > { %825 = vmatprep.subr.bf16.mxu0 %v1420_v50  ;;  %866 = vmatprep.subr.bf16.mxu1 %v1423_v51 }
  0xde   : > { %826 = vmatpush1.bf16.msra.mxu0 %v1418_v52  ;;  %867 = vmatpush1.bf16.msra.mxu1 %v1421_v53 }
  0xe1   : > { %844 = vmatmul.mubr.bf16.vlgmr.msra.gmra.mrb[4].mxu0 %v435_v55  ;;  %885 = vmatmul.mubr.bf16.vlgmr.msra.gmra.mrb[4].mxu1 %v435_v55 }
 0x194   : > { %v603_v56 = vpop.f32.mrb[0].mxu0  ;;  %v644_v57 = vpop.f32.mrb[0].mxu1 }
 0x195   : > { %v605_v58 = vpop.f32.mrb[1].mxu0  ;;  %v646_v59 = vpop.f32.mrb[1].mxu1 }
 0x196   : > { %v607_v60 = vpop.f32.mrb[2].mxu0  ;;  %v648_v61 = vpop.f32.mrb[2].mxu1 }
 0x197   : > { %v608_v62 = vpop.f32.mrb[3].mxu0  ;;  %v649_v63 = vpop.f32.mrb[3].mxu1 }
 0x1b4   : > { %v845_v8 = vpop.f32.mrb[4].mxu0  ;;  %v886_v9 = vpop.f32.mrb[4].mxu1 }
 0x1b5   : > { %v846_v11 = vadd.f32 %v845_v8, %v603_v56  ;;  %v887_v12 = vadd.f32 %v886_v9, %v644_v57  ;;  %v847_v13 = vpop.f32.mrb[5].mxu0  ;;  %v888_v14 = vpop.f32.mrb[5].mxu1 }
 0x1b6   : > { %v848_v15 = vadd.f32 %v847_v13, %v605_v58  ;;  %v889_v16 = vadd.f32 %v888_v14, %v646_v59  ;;  %v849_v17 = vpop.f32.mrb[6].mxu0  ;;  %v890_v18 = vpop.f32.mrb[6].mxu1 }
 0x1b7   : > { %v915_v19 = vadd.f32 %v898_v6, %v846_v11  ;;  %v917_v20 = vadd.f32 %v906_v7, %v887_v12  ;;  %v850_v21 = vpop.f32.mrb[7].mxu0  ;;  %v891_v22 = vpop.f32.mrb[7].mxu1 }
 0x1b8   : > { %v916_v23 = vadd.f32 %v902_v10, %v848_v15  ;;  %v918_v29 = vadd.f32 %v910_v28, %v889_v16 }
 0x1b9   : > { %v1241_v24 = vmul.f32 -1.442695, %v915_v19  ;;  %v1243_v25 = vmul.f32 -1.442695, %v917_v20 }
 0x1ba   : > { %v1242_v26 = vmul.f32 -1.442695, %v916_v23 }
 0x1bb   : > { %1424 = vpow2.f32 %v1241_v24 }
 0x1bc   : > { %1426 = vpow2.f32 %v1243_v25 }
 0x1bd   : > { %1428 = vpow2.f32 %v1242_v26 }
 0x1be   : > { %1430 = vtanh.f32 %v918_v29 }
 0x1c5   : > { %v1425_v30 = vpop.eup %1424 }
 0x1c6   : > { %v1427_v31 = vpop.eup %1426  ;;  %v922_v32 = vadd.f32 1.0, %v1425_v30 }
 0x1c7   : > { %v1429_v33 = vpop.eup %1428  ;;  %v934_v34 = vadd.f32 1.0, %v1427_v31 }
 0x1c8   : > { %1432 = vrcp.f32 %v922_v32  ;;  %v928_v35 = vadd.f32 1.0, %v1429_v33  ;;  %v1431_v36 = vpop.eup %1430 }
 0x1c9   : > { %1434 = vrcp.f32 %v934_v34 }
 0x1ca   : > { %1436 = vrcp.f32 %v928_v35 }
 0x1d2   : > { %v1433_v38 = vpop.eup %1432 }
 0x1d3   : > { %v2037_v40 = vpop.eup %1434  ;;  %v939_v41 = vmul.f32 0.5, %v1433_v38 }
 0x1d4   : > { %v1437_v42 = vpop.eup %1436  ;;  %952 = vst [vmem:[%s419_s17] sm:$0xff] %v2037_v40  ;;  %949 = vst [vmem:[#allocation4] sm:$0xff] %v2037_v40  ;;  %s2069_s17 = scalar_lea.sflag [#allocation16], %s958_s20 }
 0x1d5   : > { %v938_v43 = vmul.f32 %v1437_v42, %v432_v39  ;;  %v940_v44 = vmul.f32 %v1431_v36, %v939_v41 }
 0x1d7   : > { %v941_v45 = vadd.f32 %v940_v44, %v938_v43 }
 0x1d9   : > { %1438 = vtanh.f32 %v941_v45  ;;  %948 = vst [vmem:[#allocation3] sm:$0xff] %v941_v45  ;;  %951 = vst [vmem:[%s412_s19] sm:$0xff] %v941_v45 }
 0x1da   : > { %1595 = shalt.err (!%p1592_p2)
}
 0x1db   : > { %s1596_s19 = scalar_lea.hbm %s2055_s14, 128  ;;  %s1600_s23 = scalar_lea.hbm %s2178_s8, 1024 }
 0x1dc   : > { %p1597_p8 = scmp.ne.s32.totalorder %s2055_s14, %s1596_s19  ;;  %p1601_p11 = scmp.lt.u32.totalorder %s2055_s14, %s2178_s8 }
 0x1dd   : > { %p1602_p1 = scmp.lt.u32.totalorder %s1600_s23, %s1596_s19  ;;  %p1604_p5 = scmp.lt.u32.totalorder %s1596_s19, %s2055_s14 }
 0x1de   : > { %p1598_p3 = pnand %p1597_p8, %p2205_p7 }
 0x1df   : > { %p1603_p6 = por %p1602_p1, %p1601_p11 }
 0x1e0   : > { %p1599_p10 = pneg %p1598_p3 }
 0x1e1   : > { %p1605_p9 = por %p1604_p5, %p1603_p6 }
 0x1e3   : > { %p1606_p12 = pnand %p1605_p9, %p1599_p10 }
 0x1e5   : > { %1609 = shalt.err (!%p1606_p12)
}
 0x1e6   : > { %1271 = dma.vmem_to_hbm [thread:$0]  (%p2205_p7), %s2057_s13, 128, %s2055_s14, %s2069_s17  }
 0x1e7   : > { %s1610_s16 = scalar_lea.vmem %s2065_s24, 128  ;;  %s1727_s0 = smov [#allocation17]  }
 0x1e8   : > { %p1611_p4 = scmp.ne.s32.totalorder %s2065_s24, %s1610_s16  ;;  %s1614_s21 = sshll.u32 %s1727_s0, 4  ;;  %s1615_s21 = int_to_ptr.vmem [resolvable:$false] %s1614_s21 }
 0x1e9   : > { %s1616_s7 = scalar_lea.vmem %s1615_s21, 256  ;;  %p1617_p2 = scmp.lt.s32.totalorder %s2065_s24, %s1615_s21 }
 0x1ea   : > { %p1612_p13 = pnand %p1611_p4, %p2205_p7  ;;  %p1618_p8 = scmp.lt.s32.totalorder %s1616_s7, %s1610_s16 }
 0x1ec   : > { %p1613_p0 = pneg %p1612_p13  ;;  %p1619_p3 = por %p1618_p8, %p1617_p2 }
 0x1ee   : > { %p1620_p10 = pnand %p1619_p3, %p1613_p0 }
 0x1f0   : > { %1623 = shalt.err (!%p1620_p10)
}
 0x1f1   : > { %s1624_s13 = scalar_lea.hbm %s2063_s25, 128  ;;  %s1628_s20 = scalar_lea.hbm %s2179_s9, 1024 }
 0x1f2   : > { %p1625_p11 = scmp.ne.s32.totalorder %s2063_s25, %s1624_s13  ;;  %p1629_p5 = scmp.lt.u32.totalorder %s2063_s25, %s2179_s9 }
 0x1f3   : > { %p1630_p9 = scmp.lt.u32.totalorder %s1628_s20, %s1624_s13  ;;  %p1632_p4 = scmp.lt.u32.totalorder %s1624_s13, %s2063_s25 }
 0x1f4   : > { %p1626_p1 = pnand %p1625_p11, %p2205_p7 }
 0x1f5   : > { %p1631_p12 = por %p1630_p9, %p1629_p5 }
 0x1f6   : > { %p1627_p6 = pneg %p1626_p1 }
 0x1f7   : > { %p1633_p13 = por %p1632_p4, %p1631_p12 }
 0x1f9   : > { %p1634_p0 = pnand %p1633_p13, %p1627_p6 }
 0x1fb   : > { %1637 = shalt.err (!%p1634_p0)
}
 0x1fc   : > { %1272 = dma.vmem_to_hbm [thread:$0]  (%p2205_p7), %s2065_s24, 128, %s2063_s25, %s2069_s17   ;;  %v942_v46 = vmul.f32 0.5, %v2037_v40  ;;  %v943_v47 = vmul.f32 0.5, %v2035_v37  ;;  %v1439_v49 = vpop.eup %1438 }
 0x1fd   : > { %s2206_s16 = scalar_lea.vmem [#allocation14], %s2006_s18  ;;  %s2207_s13 = sld [smem:[#allocation25_spill]] }
 0x1fe   : > { %s977_s0 = sshll.u32 %s2206_s16, 4  ;;  %v944_v48 = vadd.f32 %v943_v47, %v942_v46  ;;  %s2208_s24 = smov %s2206_s16  ;;  %s2125_s0 = int_to_ptr.vmem [resolvable:$true] %s977_s0 }
 0x1ff   : > { %s954_s25 = scalar_lea.sflag [#allocation7], %s2003_s1  ;;  %s1638_s17 = scalar_lea.vmem %s2125_s0, 128 }
 0x200   : > { %v946_v50 = vmul.f32 %v1439_v49, %v944_v48  ;;  %p1639_p2 = scmp.ne.s32.totalorder %s2125_s0, %s1638_s17  ;;  %s1728_s19 = smov [#allocation14]  }
 0x201   : > { %s1642_s20 = sshll.u32 %s1728_s19, 4  ;;  %s1643_s20 = int_to_ptr.vmem [resolvable:$false] %s1642_s20 }
 0x202   : > { %947 = vst [vmem:[#allocation2] sm:$0xff] %v946_v50  ;;  %950 = vst [vmem:[%s2208_s24] sm:$0xff] %v946_v50  ;;  %p1640_p8 = pnand %p1639_p2, %p2205_p7  ;;  %s1644_s23 = scalar_lea.vmem %s1643_s20, 256 }
 0x203   : > { %s2123_s14 = scalar_lea.hbm %s2207_s13, %s2044_s29  ;;  %p1645_p10 = scmp.lt.s32.totalorder %s2125_s0, %s1643_s20 }
 0x204   : > { %p1641_p3 = pneg %p1640_p8  ;;  %p1646_p11 = scmp.lt.s32.totalorder %s1644_s23, %s1638_s17 }
 0x206   : > { %p1647_p1 = por %p1646_p11, %p1645_p10 }
 0x208   : > { %p1648_p6 = pnand %p1647_p1, %p1641_p3 }
 0x20a   : > { %1651 = shalt.err (!%p1648_p6)
}
 0x20b   : > { %s1652_s1 = scalar_lea.hbm %s2123_s14, 128  ;;  %s1656_s15 = scalar_lea.hbm %s2207_s13, 1024 }
 0x20c   : > { %p1653_p5 = scmp.ne.s32.totalorder %s2123_s14, %s1652_s1  ;;  %p1657_p4 = scmp.lt.u32.totalorder %s2123_s14, %s2207_s13 }
 0x20d   : > { %p1658_p13 = scmp.lt.u32.totalorder %s1656_s15, %s1652_s1  ;;  %p1660_p2 = scmp.lt.u32.totalorder %s1652_s1, %s2123_s14 }
 0x20e   : > { %p1654_p9 = pnand %p1653_p5, %p2205_p7 }
 0x20f   : > { %p1659_p0 = por %p1658_p13, %p1657_p4 }
 0x210   : > { %p1655_p12 = pneg %p1654_p9 }
 0x211   : > { %p1661_p8 = por %p1660_p2, %p1659_p0 }
 0x213   : > { %p1662_p3 = pnand %p1661_p8, %p1655_p12 }
 0x215   : > { %1665 = shalt.err (!%p1662_p3)
}
 0x216   : > { %1270 = dma.vmem_to_hbm [thread:$0]  (%p2205_p7), %s2125_s0, 128, %s2123_s14, %s954_s25  }
 0x217 PF: > { %p1312_p10 = scmp.ge.s32.totalorder %s1716_s12, 2  ;;  %s1015_s7 = sand.u32 1, %s1704_s30  }
 0x218   : > { %p2209_p11 = scmp.ne.s32.totalorder %s2196_s28, 0  ;;  %s1016_s24 = scalar_lea.sflag [#allocation7], %s1015_s7 }
 0x21a   : > { %p1294_p1 = pnand %p1312_p10, %p2209_p11 }
 0x21c   : > { %1695 = dma.done.wait (!%p1294_p1), %s1016_s24, 128  }
 0x21d   : > { %1697 = vsyncadd (!%p1294_p1), %s1016_s24, 4294967168  ;;  %s2210_s17 = sadd.s32 4294967294, %s1716_s12  }
 0x21e   : > { %s1024_s19 = sand.u32 1, %s2210_s17  }
 0x21f   : > { %s1025_s20 = scalar_lea.sflag [#allocation16], %s1024_s19 }
 0x220   : > { %1699 = dma.done.wait (!%p1294_p1), %s1025_s20, 256  }
 0x221   : > { %1701 = vsyncadd (!%p1294_p1), %s1025_s20, 4294967040  ;;  %p28_p7 = scmp.ge.s32.totalorder %s1925_s27, 10   ;;  %s2211_s30 = smov %s1708_s10 }
 0x222   : > { %s2212_s10 = smov %s1712_s11  ;;  %s2213_s11 = smov %s1936_s22 }
 0x223   : > { %s2214_s12 = smov %s1925_s27  ;;  %30 = sbr.rel (!%p28_p7) target bundleno = 13 (0xd), region = 145 }
 0x22a   :  { %1039 = vsyncpa [#allocation6], 1 }
 0x22b   :  { %1041 = vsyncpa [#allocation6 + $0x1], 1 }
 0x22c   :  { %1042 = vsyncpa [#allocation9], 1 }
 0x22d   :  { %1043 = vsyncpa [#allocation12], 1 }
 0x22e   :  { %1044 = vsyncpa [#allocation7], 1 }
 0x22f   :  { %1046 = vsyncpa [#allocation7 + $0x1], 1 }
 0x230   :  { %1047 = vsyncpa [#allocation16], 1 }
 0x231   :  { %1049 = vsyncpa [#allocation16 + $0x1], 1 }

</bundles_post_ra>
